<compile_context>
chip_gen: v7x
topology: tpu7x:2x2x1
jax: 0.10.0
libtpu: 0.0.40
codegen_flags: <defaults>
</compile_context>

<pallas_src>
import numpy as np

import jax
import jax.numpy as jnp
from jax.experimental import pallas as pl
from jax.experimental.pallas import tpu as pltpu


def _upsample_conv_kernel(x_ref, wf_ref, bias_ref, o_ref):
    # x_ref    : (nb, C_in*L)           flattened input rows, one per batch item
    # wf_ref   : (C_in*L, C_out*L_out)  folded upsample+pad+conv matrix
    # bias_ref : (1, C_out*L_out)       bias broadcast over output positions
    # o_ref    : (nb, C_out*L_out)      flattened output rows (lane-dense store)
    acc = jnp.dot(x_ref[...], wf_ref[...], preferred_element_type=jnp.float32)
    acc = acc + bias_ref[...].astype(jnp.float32)
    o_ref[...] = acc.astype(o_ref.dtype)


def _vmem_capacity_bytes():
    try:
        return int(pltpu.get_tpu_info().vmem_capacity_bytes)
    except Exception:
        return 128 << 20          # v5e/v6e physical VMEM; conservative fallback


def _pick_batch_tile(n, row_elems, out_elems, itemsize, fixed_bytes,
                     vmem_budget, min_grid_steps=1):
    """Largest batch tile nb that divides N, keeps the sublane block dim
    8-aligned (or equal to N), honours `min_grid_steps` when possible, and
    keeps the double-buffered per-step blocks plus the single-buffered
    constants inside the VMEM budget.  Bigger tiles amortize the ~0.35us
    per-grid-step overhead and feed more rows to the MXU."""
    def step_bytes(d):
        return 2 * itemsize * d * (row_elems + out_elems)   # 2x: double-buffered

    cands = [d for d in range(1, n + 1)
             if n % d == 0 and (d == n or d % 8 == 0)]
    fitting = [d for d in cands if fixed_bytes + step_bytes(d) <= vmem_budget]
    if not fitting:
        return min(cands)
    preferred = [d for d in fitting if n // d >= min_grid_steps]
    return max(preferred) if preferred else max(fitting)


def upsample_conv_layer(x, weight, bias, *, kernel_size, stride, upsample,
                        batch_tile=None, mxu_dtype=None, min_grid_steps=1):
    """x: (N, C_in, L) in PyTorch Conv1d NCL layout. Returns (N, C_out, L_out)."""
    assert upsample, "module only defines the conv path when upsample is set"
    n, c_in, l = x.shape
    c_out = weight.shape[0]
    up = int(upsample)
    pad = kernel_size // 2
    l_up = l * up
    l_pad = l_up + 2 * pad
    l_out = (l_pad - kernel_size) // stride + 1

    # ---- static host/XLA-side prep (tiny) ----------------------------------
    # G[i, k, o] = 1 iff input sample i is the nearest-upsampled source of the
    # zero-padded position (o*stride + k); padding positions stay all-zero.
    g_np = np.zeros((l, kernel_size, l_out), dtype=np.float32)
    o_idx = np.arange(l_out)
    for k in range(kernel_size):
        j = o_idx * stride + k - pad        # coord in upsampled, unpadded signal
        valid = (j >= 0) & (j < l_up)
        g_np[j[valid] // up, k, o_idx[valid]] = 1.0
    g3 = jnp.asarray(g_np)

    # Fold upsample + pad + im2col + conv into one matrix (exact: G is 0/1).
    cdt = jnp.dtype(mxu_dtype) if mxu_dtype is not None else jnp.dtype(x.dtype)
    w_fold = jnp.einsum("pqk,iko->qipo", weight.astype(jnp.float32), g3)
    w_fold = w_fold.reshape(c_in * l, c_out * l_out).astype(cdt)

    # bias broadcast over output positions -> a single lane-dense row.
    bias_fold = jnp.repeat(bias.astype(jnp.float32), l_out).reshape(1, c_out * l_out)

    # Flattened lane-dense views (free row-major metadata reshapes).
    x2 = x.reshape(n, c_in * l).astype(cdt)

    itemsize = max(cdt.itemsize, jnp.dtype(x.dtype).itemsize)
    fixed_bytes = cdt.itemsize * w_fold.size + 4 * bias_fold.size  # single-buffered
    cap = _vmem_capacity_bytes()
    budget = min(16 << 20, max(6 << 20, cap // 8))
    if batch_tile is None:
        batch_tile = _pick_batch_tile(n, c_in * l, c_out * l_out, itemsize,
                                      fixed_bytes, budget, min_grid_steps)
    nb = batch_tile
    assert n % nb == 0, "batch_tile must divide the batch size"

    step_bytes = 2 * nb * (cdt.itemsize * c_in * l
                           + jnp.dtype(x.dtype).itemsize * c_out * l_out)
    needed = fixed_bytes + step_bytes
    vmem_limit = None
    if needed > (12 << 20):                      # past small scoped defaults
        vmem_limit = int(min(cap * 3 // 4, needed + (4 << 20)))

    def _run(single_buffer_constants):
        const_kwargs = ({"pipeline_mode": pl.Buffered(1)}
                        if single_buffer_constants else {})
        return pl.pallas_call(
            _upsample_conv_kernel,
            out_shape=jax.ShapeDtypeStruct((n, c_out * l_out), x.dtype),
            grid_spec=pltpu.PrefetchScalarGridSpec(
                num_scalar_prefetch=0,
                grid=(n // nb,),
                in_specs=[
                    pl.BlockSpec((nb, c_in * l), lambda i: (i, 0)),           # x
                    pl.BlockSpec((c_in * l, c_out * l_out), lambda i: (0, 0), # W_fold
                                 **const_kwargs),
                    pl.BlockSpec((1, c_out * l_out), lambda i: (0, 0),        # bias
                                 **const_kwargs),
                ],
                out_specs=pl.BlockSpec((nb, c_out * l_out), lambda i: (i, 0)),
            ),
            compiler_params=pltpu.CompilerParams(
                dimension_semantics=("parallel",),
                vmem_limit_bytes=vmem_limit),
        )(x2, w_fold, bias_fold)

    try:
        out2 = _run(True)        # single-buffer the loop-invariant operands
    except Exception:            # pipeline_mode is experimental; fall back
        out2 = _run(False)

    return out2.reshape(n, c_out, l_out)        # free metadata reshape


def _reference(x, weight, bias, *, kernel_size, stride, upsample):
    """Pure-JAX reference mirroring the PyTorch forward."""
    if upsample:
        x = jnp.repeat(x, upsample, axis=-1)    # nearest upsample along length
    pad = kernel_size // 2
    x = jnp.pad(x, ((0, 0), (0, 0), (pad, pad)))
    out = jax.lax.conv_general_dilated(
        x, weight,
        window_strides=(stride,),
        padding="VALID",
        dimension_numbers=("NCH", "OIH", "NCH"),
    )
    return out + bias.reshape(1, -1, 1)


if __name__ == "__main__":
    # Module config
    in_channels, out_channels = 4, 8
    kernel_size, stride, upsample = 3, 1, 2

    # Small deterministic inputs / params
    N, L = 2, 16
    key = jax.random.PRNGKey(0)
    kx, kw, kb = jax.random.split(key, 3)
    x = jax.random.normal(kx, (N, in_channels, L), dtype=jnp.float32)

    # Deterministic Conv1d-style init (uniform in +-1/sqrt(fan_in))
    fan_in = in_channels * kernel_size
    bound = 1.0 / (fan_in ** 0.5)
    weight = jax.random.uniform(
        kw, (out_channels, in_channels, kernel_size),
        minval=-bound, maxval=bound, dtype=jnp.float32)
    bias = jax.random.uniform(
        kb, (out_channels,), minval=-bound, maxval=bound, dtype=jnp.float32)

    out = upsample_conv_layer(
        x, weight, bias,
        kernel_size=kernel_size, stride=stride, upsample=upsample)
    out = jax.block_until_ready(out)

    ref = _reference(
        x, weight, bias,
        kernel_size=kernel_size, stride=stride, upsample=upsample)

    assert out.shape == (N, out_channels, L * upsample), out.shape
    assert jnp.allclose(out, ref, atol=1e-5, rtol=1e-5), "mismatch vs reference"
    print("KERNEL_OK")
</pallas_src>

<mosaic_0001>
module attributes {stable_mosaic.version = 11 : i64} {
  func.func @_upsample_conv_kernel(%arg0: i32, %arg1: memref<2x64xf32, #tpu.memory_space<vmem>>, %arg2: memref<64x256xf32, #tpu.memory_space<vmem>>, %arg3: memref<1x256xf32, #tpu.memory_space<vmem>>, %arg4: memref<2x256xf32, #tpu.memory_space<vmem>>) attributes {dimension_semantics = [#tpu.dimension_semantics<parallel>], iteration_bounds = array<i64: 1>, scalar_prefetch = 0 : i64, scratch_operands = 0 : i64, tpu.core_type = #tpu.core_type<tc>, window_params = [{transform_indices = @transform_0, window_bounds = array<i64: 2, 64>}, {pipeline_mode = #tpu.pipeline_mode<synchronous>, transform_indices = @transform_1, window_bounds = array<i64: 64, 256>}, {pipeline_mode = #tpu.pipeline_mode<synchronous>, transform_indices = @transform_2, window_bounds = array<i64: 1, 256>}, {transform_indices = @transform_3, window_bounds = array<i64: 2, 256>}]} {
    %c0 = arith.constant 0 : index
    %c0_0 = arith.constant 0 : index
    %0 = vector.load %arg1[%c0, %c0_0] : memref<2x64xf32, #tpu.memory_space<vmem>>, vector<2x64xf32>
    %c0_1 = arith.constant 0 : index
    %c0_2 = arith.constant 0 : index
    %1 = vector.load %arg2[%c0_1, %c0_2] : memref<64x256xf32, #tpu.memory_space<vmem>>, vector<64x256xf32>
    %cst = arith.constant dense<0.000000e+00> : vector<2x256xf32>
    %2 = tpu.matmul %0, %1, %cst {dimension_numbers = #tpu.dot_dimension_numbers<[1], [0], [0], [1], [0, 0, 1, 1], [], []>} : vector<2x64xf32>, vector<64x256xf32>, vector<2x256xf32> -> vector<2x256xf32>
    %c0_3 = arith.constant 0 : index
    %c0_4 = arith.constant 0 : index
    %3 = vector.load %arg3[%c0_3, %c0_4] : memref<1x256xf32, #tpu.memory_space<vmem>>, vector<1x256xf32>
    %4 = vector.broadcast %3 : vector<1x256xf32> to vector<2x256xf32>
    %5 = arith.addf %2, %4 : vector<2x256xf32>
    %c0_5 = arith.constant 0 : index
    %c0_6 = arith.constant 0 : index
    %6 = vector.load %arg4[%c0_5, %c0_6] : memref<2x256xf32, #tpu.memory_space<vmem>>, vector<2x256xf32>
    tpu.vector_store %arg4[%c0_5, %c0_6], %5 {strides = array<i32>} : memref<2x256xf32, #tpu.memory_space<vmem>>, vector<2x256xf32>,
    return
  }
  func.func @transform_0(%arg0: i32) -> (i32, i32) {
    %c0_i32 = arith.constant 0 : i32
    %c0_i32_0 = arith.constant 0 : i32
    return %arg0, %c0_i32 : i32, i32
  }
  func.func @transform_1(%arg0: i32) -> (i32, i32) {
    %c0_i32 = arith.constant 0 : i32
    %c0_i32_0 = arith.constant 0 : i32
    %c0_i32_1 = arith.constant 0 : i32
    return %c0_i32, %c0_i32_0 : i32, i32
  }
  func.func @transform_2(%arg0: i32) -> (i32, i32) {
    %c0_i32 = arith.constant 0 : i32
    %c0_i32_0 = arith.constant 0 : i32
    %c0_i32_1 = arith.constant 0 : i32
    return %c0_i32, %c0_i32_0 : i32, i32
  }
  func.func @transform_3(%arg0: i32) -> (i32, i32) {
    %c0_i32 = arith.constant 0 : i32
    %c0_i32_0 = arith.constant 0 : i32
    return %arg0, %c0_i32 : i32, i32
  }
}

module attributes {stable_mosaic.version = 11 : i64} {
  func.func @_upsample_conv_kernel(%arg0: i32, %arg1: memref<2x64xf32, #tpu.memory_space<vmem>>, %arg2: memref<64x256xf32, #tpu.memory_space<vmem>>, %arg3: memref<1x256xf32, #tpu.memory_space<vmem>>, %arg4: memref<2x256xf32, #tpu.memory_space<vmem>>) attributes {dimension_semantics = [#tpu.dimension_semantics<parallel>], iteration_bounds = array<i64: 1>, scalar_prefetch = 0 : i64, scratch_operands = 0 : i64, tpu.core_type = #tpu.core_type<tc>, window_params = [{transform_indices = @transform_0, window_bounds = array<i64: 2, 64>}, {pipeline_mode = #tpu.pipeline_mode<synchronous>, transform_indices = @transform_1, window_bounds = array<i64: 64, 256>}, {pipeline_mode = #tpu.pipeline_mode<synchronous>, transform_indices = @transform_2, window_bounds = array<i64: 1, 256>}, {transform_indices = @transform_3, window_bounds = array<i64: 2, 256>}]} {
    %c0 = arith.constant 0 : index
    %c0_0 = arith.constant 0 : index
    %0 = vector.load %arg1[%c0, %c0_0] : memref<2x64xf32, #tpu.memory_space<vmem>>, vector<2x64xf32>
    %c0_1 = arith.constant 0 : index
    %c0_2 = arith.constant 0 : index
    %1 = vector.load %arg2[%c0_1, %c0_2] : memref<64x256xf32, #tpu.memory_space<vmem>>, vector<64x256xf32>
    %cst = arith.constant dense<0.000000e+00> : vector<2x256xf32>
    %2 = tpu.matmul %0, %1, %cst {dimension_numbers = #tpu.dot_dimension_numbers<[1], [0], [0], [1], [0, 0, 1, 1], [], []>} : vector<2x64xf32>, vector<64x256xf32>, vector<2x256xf32> -> vector<2x256xf32>
    %c0_3 = arith.constant 0 : index
    %c0_4 = arith.constant 0 : index
    %3 = vector.load %arg3[%c0_3, %c0_4] : memref<1x256xf32, #tpu.memory_space<vmem>>, vector<1x256xf32>
    %4 = vector.broadcast %3 : vector<1x256xf32> to vector<2x256xf32>
    %5 = arith.addf %2, %4 : vector<2x256xf32>
    %c0_5 = arith.constant 0 : index
    %c0_6 = arith.constant 0 : index
    %6 = vector.load %arg4[%c0_5, %c0_6] : memref<2x256xf32, #tpu.memory_space<vmem>>, vector<2x256xf32>
    tpu.vector_store %arg4[%c0_5, %c0_6], %5 {strides = array<i32>} : memref<2x256xf32, #tpu.memory_space<vmem>>, vector<2x256xf32>,
    return
  }
  func.func @transform_0(%arg0: i32) -> (i32, i32) {
    %c0_i32 = arith.constant 0 : i32
    %c0_i32_0 = arith.constant 0 : i32
    return %arg0, %c0_i32 : i32, i32
  }
  func.func @transform_1(%arg0: i32) -> (i32, i32) {
    %c0_i32 = arith.constant 0 : i32
    %c0_i32_0 = arith.constant 0 : i32
    %c0_i32_1 = arith.constant 0 : i32
    return %c0_i32, %c0_i32_0 : i32, i32
  }
  func.func @transform_2(%arg0: i32) -> (i32, i32) {
    %c0_i32 = arith.constant 0 : i32
    %c0_i32_0 = arith.constant 0 : i32
    %c0_i32_1 = arith.constant 0 : i32
    return %c0_i32, %c0_i32_0 : i32, i32
  }
  func.func @transform_3(%arg0: i32) -> (i32, i32) {
    %c0_i32 = arith.constant 0 : i32
    %c0_i32_0 = arith.constant 0 : i32
    return %arg0, %c0_i32 : i32, i32
  }
}

</mosaic_0001>

<bundles_post_ra>
// kernel: tpu_custom_call.1
= control target key start
LH: loop header
LB: loop body
LE: loop exit
PB: predicated region body
PF: predicated region fallthrough
CT: control target
= control target key end

     0   :  { %8 = vsyncpa [#allocation3], 0  ;;  %s341_s0 = inlined_call_operand.hbm [shape: f32[2,64], index: 0, kind: input, shape index: {}]   ;;  %s342_s1 = inlined_call_operand.hbm [shape: f32[64,256], index: 1, kind: input, shape index: {}]   ;;  %s343_s2 = inlined_call_operand.vmem [shape: f32[1,256], index: 2, kind: input, shape index: {}]   ;;  %s344_s3 = inlined_call_operand.hbm [shape: f32[2,256], index: 3, kind: output, shape index: {}]  }
   0x1   :  { %9 = vsyncpa [#allocation6], 0 }
   0x2   :  { %10 = vsyncpa [#allocation4], 0  ;;  %s269_s12 = smov [#allocation2]   ;;  %s270_s14 = smov [#allocation5]  }
   0x3   :  { %s17_s13 = sshll.u32 %s269_s12, 4  ;;  %s26_s15 = sshll.u32 %s270_s14, 4  ;;  %s18_s13 = int_to_ptr.vmem [resolvable:$true] %s17_s13  ;;  %s295_s15 = int_to_ptr.vmem [resolvable:$true] %s26_s15 }
   0x4   :  { %s197_s18 = scalar_lea.hbm %s341_s0, 32 }
   0x5   :  { %p198_p0 = scmp.ne.s32.totalorder %s341_s0, %s197_s18  ;;  %p201_p1 = scmp.lt.u32.totalorder %s197_s18, %s341_s0 }
   0x7   :  { %p203_p2 = pnand %p201_p1, %p198_p0 }
   0x9   :  { %206 = shalt.err (!%p203_p2)
}
   0xa   :  { %s207_s23 = scalar_lea.vmem %s18_s13, 32  ;;  %p212_p4 = scmp.lt.s32.totalorder %s18_s13, %s18_s13 }
   0xb   :  { %p208_p3 = scmp.ne.s32.totalorder %s18_s13, %s207_s23  ;;  %p213_p5 = scmp.lt.s32.totalorder %s207_s23, %s207_s23 }
   0xd   :  { %p214_p6 = por %p213_p5, %p212_p4 }
   0xf   :  { %p215_p7 = pnand %p214_p6, %p208_p3 }
  0x11   :  { %218 = shalt.err (!%p215_p7)
}
  0x12   :  { %20 = dma.hbm_to_vmem [thread:$0]  %s341_s0, 32, %s18_s13, [#allocation3]  }
  0x13   :  { %s219_s28 = scalar_lea.hbm %s342_s1, 2048 }
  0x14   :  { %p220_p8 = scmp.ne.s32.totalorder %s342_s1, %s219_s28  ;;  %p223_p9 = scmp.lt.u32.totalorder %s219_s28, %s342_s1 }
  0x16   :  { %p225_p10 = pnand %p223_p9, %p220_p8 }
  0x18   :  { %228 = shalt.err (!%p225_p10)
}
  0x19   :  { %s229_s6 = scalar_lea.vmem %s295_s15, 2048  ;;  %p234_p12 = scmp.lt.s32.totalorder %s295_s15, %s295_s15 }
  0x1a   :  { %p230_p11 = scmp.ne.s32.totalorder %s295_s15, %s229_s6  ;;  %p235_p13 = scmp.lt.s32.totalorder %s229_s6, %s229_s6 }
  0x1c   :  { %p236_p0 = por %p235_p13, %p234_p12 }
  0x1e   :  { %p237_p1 = pnand %p236_p0, %p230_p11 }
  0x20   :  { %240 = shalt.err (!%p237_p1)
}
  0x21   :  { %s271_s0 = smov 256   ;;  %s272_s7 = smov 16  }
  0x22   :  { %32 = dma.hbm_to_vmem [thread:$0]  %s342_s1, 2048, %s295_s15, [#allocation6], %s271_s0, %s271_s0, %s272_s7  }
  0x23   :  { %263 = dma.done.wait [#allocation3], 32  }
  0x24   :  { %264 = vsyncadd [#allocation3], 4294967264 }
  0x25   :  { %265 = dma.done.wait [#allocation6], 2048  }
  0x26   :  { %266 = vsyncadd [#allocation6], 4294965248  ;;  %v273_v0 = vmov 0.0   ;;  %v43_v1 = vld [vmem:[#allocation5 + $0x8] sm:$0xff]  ;;  %v45_v2 = vld [vmem:[#allocation5 + $0x18] sm:$0xff]  ;;  %vm70_vm0 = vcmask 523264   ;;  %v60_v26 = vlaneseq }
  0x27   :  { %138 = vmatprep.mubr.f32.mxu0 %v273_v0  ;;  %v42_v3 = vld [vmem:[#allocation5] sm:$0xff]  ;;  %v175_v4 = vpack.c.bf16 %v45_v2, %v43_v1  ;;  %v44_v5 = vld [vmem:[#allocation5 + $0x10] sm:$0xff]  ;;  %v47_v6 = vld [vmem:[#allocation5 + $0x28] sm:$0xff]  ;;  %s274_s11 = smov [#allocation7]  }
  0x28   :  { %v49_v7 = vld [vmem:[#allocation5 + $0x38] sm:$0xff]  ;;  %v177_v8 = vpack.c.bf16 %v44_v5, %v42_v3  ;;  %v46_v10 = vld [vmem:[#allocation5 + $0x20] sm:$0xff]  ;;  %v48_v11 = vld [vmem:[#allocation5 + $0x30] sm:$0xff]  ;;  %v61_v27 = vshrl.u32 %v60_v26, 7  ;;  %s163_s12 = sshll.u32 %s274_s11, 4  ;;  %s164_s12 = int_to_ptr.vmem [resolvable:$true] %s163_s12 }
  0x29   :  { %v179_v9 = vpack.c.bf16 %v49_v7, %v47_v6  ;;  %v51_v12 = vld [vmem:[#allocation5 + $0x48] sm:$0xff]  ;;  %176 = vmatprep.subr.bf16.mxu0 %v175_v4  ;;  %v53_v13 = vld [vmem:[#allocation5 + $0x58] sm:$0xff]  ;;  %v181_v14 = vpack.c.bf16 %v48_v11, %v46_v10  ;;  %v50_v16 = vld [vmem:[#allocation5 + $0x40] sm:$0xff]  ;;  %s241_s13 = scalar_lea.vmem %s164_s12, 64  ;;  %p246_p3 = scmp.lt.s32.totalorder %s164_s12, %s164_s12 }
  0x2a   :  { %178 = vmatpush1.bf16.msra.mxu0 %v177_v8  ;;  %v183_v15 = vpack.c.bf16 %v53_v13, %v51_v12  ;;  %v52_v17 = vld [vmem:[#allocation5 + $0x50] sm:$0xff]  ;;  %v55_v18 = vld [vmem:[#allocation5 + $0x68] sm:$0xff]  ;;  %v57_v19 = vld [vmem:[#allocation5 + $0x78] sm:$0xff]  ;;  %v62_v28 = vsub.s32 0, %v61_v27  ;;  %v66_v30 = vsub.s32 1, %v61_v27  ;;  %p242_p2 = scmp.ne.s32.totalorder %s164_s12, %s241_s13  ;;  %p247_p4 = scmp.lt.s32.totalorder %s241_s13, %s241_s13 }
  0x2b   :  { %180 = vmatprep.subr.bf16.mxu0 %v179_v9  ;;  %v185_v20 = vpack.c.bf16 %v52_v17, %v50_v16  ;;  %v187_v21 = vpack.c.bf16 %v57_v19, %v55_v18  ;;  %v54_v22 = vld [vmem:[#allocation5 + $0x60] sm:$0xff]  ;;  %v56_v23 = vld [vmem:[#allocation5 + $0x70] sm:$0xff]  ;;  %v41_v25 = vld [vmem:[#allocation2] sm:$0x3] }
  0x2c   :  { %v189_v24 = vpack.c.bf16 %v56_v23, %v54_v22  ;;  %v58_v29 = vld [vmem:[%s343_s2] sm:$0x3]  ;;  %p248_p5 = por %p247_p4, %p246_p3 }
  0x2d   :  { %v63_v31 = vrot.slane %v58_v29, %v62_v28  ;;  %v67_v32 = vrot.slane %v58_v29, %v66_v30 }
  0x2e   :  { %182 = vmatpush1.bf16.msra.mxu0 %v181_v14  ;;  %p249_p6 = pnand %p248_p5, %p242_p2 }
  0x2f   :  { %184 = vmatprep.subr.bf16.mxu0 %v183_v15 }
  0x32   :  { %186 = vmatpush1.bf16.msra.mxu0 %v185_v20 }
  0x33   :  { %188 = vmatprep.subr.bf16.mxu0 %v187_v21 }
  0x36   :  { %190 = vmatpush1.bf16.msra.mxu0 %v189_v24 }
  0x39   :  { %173 = vmatmul.mubr.msk.f32.vlgmr.msra.gmra.mrb[0].mxu0 %vm70_vm0, %v41_v25 }
 0x10c   :  { %v140_v33 = vpop.f32.mrb[0].mxu0 }
 0x10d   :  { %v141_v34 = vadd.f32 %v140_v33, %v63_v31  ;;  %v142_v35 = vpop.f32.mrb[1].mxu0 }
 0x10e   :  { %v143_v36 = vadd.f32 %v142_v35, %v67_v32 }
 0x110   :  { %v147_v37 = vcombine.low %v141_v34, %v143_v36 }
 0x112   :  { %174 = vst.sshfl [vmem:[#allocation7] sm:$0x33 pattern:$0x76325410] %v147_v37 }
 0x113   :  { %252 = shalt.err (!%p249_p6)
}
 0x114   :  { %s253_s15 = scalar_lea.hbm %s344_s3, 64 }
 0x115   :  { %p254_p7 = scmp.ne.s32.totalorder %s344_s3, %s253_s15  ;;  %p257_p8 = scmp.lt.u32.totalorder %s253_s15, %s344_s3 }
 0x117   :  { %p259_p9 = pnand %p257_p8, %p254_p7 }
 0x119   :  { %262 = shalt.err (!%p259_p9)
}
 0x11a   :  { %166 = dma.vmem_to_hbm [thread:$0]  %s164_s12, 64, %s344_s3, [#allocation4]  }
 0x11b   :  { %267 = dma.done.wait [#allocation4], 64  }
 0x11c   :  { %268 = vsyncadd [#allocation4], 4294967232 }
 0x11d   :  { %170 = vsyncpa [#allocation3], 1 }
 0x11e   :  { %171 = vsyncpa [#allocation6], 1 }
 0x11f   :  { %172 = vsyncpa [#allocation4], 1 }

// kernel: tpu_custom_call.1
= control target key start
LH: loop header
LB: loop body
LE: loop exit
PB: predicated region body
PF: predicated region fallthrough
CT: control target
= control target key end

     0   :  { %8 = vsyncpa [#allocation3], 0  ;;  %s341_s0 = inlined_call_operand.hbm [shape: f32[2,64], index: 0, kind: input, shape index: {}]   ;;  %s342_s1 = inlined_call_operand.hbm [shape: f32[64,256], index: 1, kind: input, shape index: {}]   ;;  %s343_s2 = inlined_call_operand.vmem [shape: f32[1,256], index: 2, kind: input, shape index: {}]   ;;  %s344_s3 = inlined_call_operand.hbm [shape: f32[2,256], index: 3, kind: output, shape index: {}]  }
   0x1   :  { %9 = vsyncpa [#allocation6], 0 }
   0x2   :  { %10 = vsyncpa [#allocation4], 0  ;;  %s269_s12 = smov [#allocation2]   ;;  %s270_s14 = smov [#allocation5]  }
   0x3   :  { %s17_s13 = sshll.u32 %s269_s12, 4  ;;  %s26_s15 = sshll.u32 %s270_s14, 4  ;;  %s18_s13 = int_to_ptr.vmem [resolvable:$true] %s17_s13  ;;  %s295_s15 = int_to_ptr.vmem [resolvable:$true] %s26_s15 }
   0x4   :  { %s197_s18 = scalar_lea.hbm %s341_s0, 32 }
   0x5   :  { %p198_p0 = scmp.ne.s32.totalorder %s341_s0, %s197_s18  ;;  %p201_p1 = scmp.lt.u32.totalorder %s197_s18, %s341_s0 }
   0x7   :  { %p203_p2 = pnand %p201_p1, %p198_p0 }
   0x9   :  { %206 = shalt.err (!%p203_p2)
}
   0xa   :  { %s207_s23 = scalar_lea.vmem %s18_s13, 32  ;;  %p212_p4 = scmp.lt.s32.totalorder %s18_s13, %s18_s13 }
   0xb   :  { %p208_p3 = scmp.ne.s32.totalorder %s18_s13, %s207_s23  ;;  %p213_p5 = scmp.lt.s32.totalorder %s207_s23, %s207_s23 }
   0xd   :  { %p214_p6 = por %p213_p5, %p212_p4 }
   0xf   :  { %p215_p7 = pnand %p214_p6, %p208_p3 }
  0x11   :  { %218 = shalt.err (!%p215_p7)
}
  0x12   :  { %20 = dma.hbm_to_vmem [thread:$0]  %s341_s0, 32, %s18_s13, [#allocation3]  }
  0x13   :  { %s219_s28 = scalar_lea.hbm %s342_s1, 2048 }
  0x14   :  { %p220_p8 = scmp.ne.s32.totalorder %s342_s1, %s219_s28  ;;  %p223_p9 = scmp.lt.u32.totalorder %s219_s28, %s342_s1 }
  0x16   :  { %p225_p10 = pnand %p223_p9, %p220_p8 }
  0x18   :  { %228 = shalt.err (!%p225_p10)
}
  0x19   :  { %s229_s6 = scalar_lea.vmem %s295_s15, 2048  ;;  %p234_p12 = scmp.lt.s32.totalorder %s295_s15, %s295_s15 }
  0x1a   :  { %p230_p11 = scmp.ne.s32.totalorder %s295_s15, %s229_s6  ;;  %p235_p13 = scmp.lt.s32.totalorder %s229_s6, %s229_s6 }
  0x1c   :  { %p236_p0 = por %p235_p13, %p234_p12 }
  0x1e   :  { %p237_p1 = pnand %p236_p0, %p230_p11 }
  0x20   :  { %240 = shalt.err (!%p237_p1)
}
  0x21   :  { %s271_s0 = smov 256   ;;  %s272_s7 = smov 16  }
  0x22   :  { %32 = dma.hbm_to_vmem [thread:$0]  %s342_s1, 2048, %s295_s15, [#allocation6], %s271_s0, %s271_s0, %s272_s7  }
  0x23   :  { %263 = dma.done.wait [#allocation3], 32  }
  0x24   :  { %264 = vsyncadd [#allocation3], 4294967264 }
  0x25   :  { %265 = dma.done.wait [#allocation6], 2048  }
  0x26   :  { %266 = vsyncadd [#allocation6], 4294965248  ;;  %v273_v0 = vmov 0.0   ;;  %v43_v1 = vld [vmem:[#allocation5 + $0x8] sm:$0xff]  ;;  %v45_v2 = vld [vmem:[#allocation5 + $0x18] sm:$0xff]  ;;  %vm70_vm0 = vcmask 523264   ;;  %v60_v26 = vlaneseq }
  0x27   :  { %138 = vmatprep.mubr.f32.mxu0 %v273_v0  ;;  %v42_v3 = vld [vmem:[#allocation5] sm:$0xff]  ;;  %v175_v4 = vpack.c.bf16 %v45_v2, %v43_v1  ;;  %v44_v5 = vld [vmem:[#allocation5 + $0x10] sm:$0xff]  ;;  %v47_v6 = vld [vmem:[#allocation5 + $0x28] sm:$0xff]  ;;  %s274_s11 = smov [#allocation7]  }
  0x28   :  { %v49_v7 = vld [vmem:[#allocation5 + $0x38] sm:$0xff]  ;;  %v177_v8 = vpack.c.bf16 %v44_v5, %v42_v3  ;;  %v46_v10 = vld [vmem:[#allocation5 + $0x20] sm:$0xff]  ;;  %v48_v11 = vld [vmem:[#allocation5 + $0x30] sm:$0xff]  ;;  %v61_v27 = vshrl.u32 %v60_v26, 7  ;;  %s163_s12 = sshll.u32 %s274_s11, 4  ;;  %s164_s12 = int_to_ptr.vmem [resolvable:$true] %s163_s12 }
  0x29   :  { %v179_v9 = vpack.c.bf16 %v49_v7, %v47_v6  ;;  %v51_v12 = vld [vmem:[#allocation5 + $0x48] sm:$0xff]  ;;  %176 = vmatprep.subr.bf16.mxu0 %v175_v4  ;;  %v53_v13 = vld [vmem:[#allocation5 + $0x58] sm:$0xff]  ;;  %v181_v14 = vpack.c.bf16 %v48_v11, %v46_v10  ;;  %v50_v16 = vld [vmem:[#allocation5 + $0x40] sm:$0xff]  ;;  %s241_s13 = scalar_lea.vmem %s164_s12, 64  ;;  %p246_p3 = scmp.lt.s32.totalorder %s164_s12, %s164_s12 }
  0x2a   :  { %178 = vmatpush1.bf16.msra.mxu0 %v177_v8  ;;  %v183_v15 = vpack.c.bf16 %v53_v13, %v51_v12  ;;  %v52_v17 = vld [vmem:[#allocation5 + $0x50] sm:$0xff]  ;;  %v55_v18 = vld [vmem:[#allocation5 + $0x68] sm:$0xff]  ;;  %v57_v19 = vld [vmem:[#allocation5 + $0x78] sm:$0xff]  ;;  %v62_v28 = vsub.s32 0, %v61_v27  ;;  %v66_v30 = vsub.s32 1, %v61_v27  ;;  %p242_p2 = scmp.ne.s32.totalorder %s164_s12, %s241_s13  ;;  %p247_p4 = scmp.lt.s32.totalorder %s241_s13, %s241_s13 }
  0x2b   :  { %180 = vmatprep.subr.bf16.mxu0 %v179_v9  ;;  %v185_v20 = vpack.c.bf16 %v52_v17, %v50_v16  ;;  %v187_v21 = vpack.c.bf16 %v57_v19, %v55_v18  ;;  %v54_v22 = vld [vmem:[#allocation5 + $0x60] sm:$0xff]  ;;  %v56_v23 = vld [vmem:[#allocation5 + $0x70] sm:$0xff]  ;;  %v41_v25 = vld [vmem:[#allocation2] sm:$0x3] }
  0x2c   :  { %v189_v24 = vpack.c.bf16 %v56_v23, %v54_v22  ;;  %v58_v29 = vld [vmem:[%s343_s2] sm:$0x3]  ;;  %p248_p5 = por %p247_p4, %p246_p3 }
  0x2d   :  { %v63_v31 = vrot.slane %v58_v29, %v62_v28  ;;  %v67_v32 = vrot.slane %v58_v29, %v66_v30 }
  0x2e   :  { %182 = vmatpush1.bf16.msra.mxu0 %v181_v14  ;;  %p249_p6 = pnand %p248_p5, %p242_p2 }
  0x2f   :  { %184 = vmatprep.subr.bf16.mxu0 %v183_v15 }
  0x32   :  { %186 = vmatpush1.bf16.msra.mxu0 %v185_v20 }
  0x33   :  { %188 = vmatprep.subr.bf16.mxu0 %v187_v21 }
  0x36   :  { %190 = vmatpush1.bf16.msra.mxu0 %v189_v24 }
  0x39   :  { %173 = vmatmul.mubr.msk.f32.vlgmr.msra.gmra.mrb[0].mxu0 %vm70_vm0, %v41_v25 }
 0x10c   :  { %v140_v33 = vpop.f32.mrb[0].mxu0 }
 0x10d   :  { %v141_v34 = vadd.f32 %v140_v33, %v63_v31  ;;  %v142_v35 = vpop.f32.mrb[1].mxu0 }
 0x10e   :  { %v143_v36 = vadd.f32 %v142_v35, %v67_v32 }
 0x110   :  { %v147_v37 = vcombine.low %v141_v34, %v143_v36 }
 0x112   :  { %174 = vst.sshfl [vmem:[#allocation7] sm:$0x33 pattern:$0x76325410] %v147_v37 }
 0x113   :  { %252 = shalt.err (!%p249_p6)
}
 0x114   :  { %s253_s15 = scalar_lea.hbm %s344_s3, 64 }
 0x115   :  { %p254_p7 = scmp.ne.s32.totalorder %s344_s3, %s253_s15  ;;  %p257_p8 = scmp.lt.u32.totalorder %s253_s15, %s344_s3 }
 0x117   :  { %p259_p9 = pnand %p257_p8, %p254_p7 }
 0x119   :  { %262 = shalt.err (!%p259_p9)
}
 0x11a   :  { %166 = dma.vmem_to_hbm [thread:$0]  %s164_s12, 64, %s344_s3, [#allocation4]  }
 0x11b   :  { %267 = dma.done.wait [#allocation4], 64  }
 0x11c   :  { %268 = vsyncadd [#allocation4], 4294967232 }
 0x11d   :  { %170 = vsyncpa [#allocation3], 1 }
 0x11e   :  { %171 = vsyncpa [#allocation6], 1 }
 0x11f   :  { %172 = vsyncpa [#allocation4], 1 }

</bundles_post_ra>
